<compile_context>
chip_gen: v7x
topology: tpu7x:2x2x1
jax: 0.10.0
libtpu: 0.0.40
codegen_flags: <defaults>
</compile_context>

<pallas_src>
import numpy as np
import jax
import jax.numpy as jnp
from jax import lax
from jax.experimental import pallas as pl
from jax.experimental.pallas import tpu as pltpu

LENGTH = 8          # AdjustableLengthAttention(channels, length=8)
NEG_INF = -1e30     # large finite sentinel (avoids inf - inf -> NaN)


# ----------------------------------------------------------------------------
# Kernel: one attention *instance* (one image + one layer's weights) per grid step.
# Block shapes (channel-major, batch folded into the pixel axis N = B*H*W):
#   x_ref    (1, C, N)     raw input image, channel-major
#   pos_ref  (C, N)        position embedding (shared across instances)
#   w_ref    (1, 2C, C)    [Wv | Wq@Wk^T]^T   (host-folded)
#   b_ref    (1, 2C, 1)    [bv | bq@Wk^T]^T
#   bias_ref (N, N)        0 / -1e30 block-diagonal criss-cross mask (static)
#   gamma_ref (n_inst, 1)  SMEM, per-instance residual scale
#   o_ref    (1, C, N)
# ----------------------------------------------------------------------------
def _ala_fused_kernel(x_ref, pos_ref, w_ref, b_ref, bias_ref, gamma_ref, o_ref):
    C = x_ref.shape[1]

    # Fused position-embedding add (was a separate XLA op per image).
    x = x_ref[0] + pos_ref[...]                                        # (C, N)

    # One fused channel GEMM: rows 0..C-1 -> V^T (+bv), rows C..2C-1 -> (Wq Wk^T)^T X^T
    # (+ (bq Wk^T)^T, the only bias term that does not cancel in the softmax).
    vqm = jnp.dot(w_ref[0], x, preferred_element_type=jnp.float32) + b_ref[0]   # (2C, N)
    v = vqm[:C]                                                        # (C, N) sublane slice
    qm = vqm[C:]                                                       # (C, N)

    # Dense pixel-pixel energies over the folded batch axis, masked (via additive bias)
    # to "same image AND (same row OR same column)".  This exactly reproduces the
    # reference's softmax over concat([energy_H with -inf diag, energy_W]).
    e = lax.dot_general(qm, x, (((0,), (0,)), ((), ())),
                        preferred_element_type=jnp.float32)            # (N, N)
    e = e + bias_ref[...]

    m = jnp.max(e, axis=-1, keepdims=True)
    p = jnp.exp(e - m)
    att = p * pl.reciprocal(jnp.sum(p, axis=-1, keepdims=True), approx=True)

    # out^T = V^T @ att^T  -> channel-major result, full-128-lane unmasked stores.
    out = lax.dot_general(v, att, (((1,), (1,)), ((), ())),
                          preferred_element_type=jnp.float32)          # (C, N)

    gamma = gamma_ref[pl.program_id(0), 0]
    o_ref[0] = (gamma * out + x).astype(o_ref.dtype)                   # residual on x1 (pos-embedded)


# ----------------------------------------------------------------------------
# Host-built static mask: block-diagonal over the folded batch, criss-cross inside.
# ----------------------------------------------------------------------------
def _criss_cross_bias(B, H, W):
    HW = H * W
    idx = np.arange(B * HW)
    b, rem = idx // HW, idx % HW
    h, w = rem // W, rem % W
    same_img = b[:, None] == b[None, :]
    allowed = same_img & ((h[:, None] == h[None, :]) | (w[:, None] == w[None, :]))
    return jnp.asarray(np.where(allowed, 0.0, NEG_INF), dtype=jnp.float32)


def _fold_attention_params(p):
    """Fold Wq@Wk^T and the exactly-foldable bias terms into one (2C, C) weight."""
    wqk = p["wq"] @ p["wk"].T                             # (C, C)
    bqk = p["bq"] @ p["wk"].T                             # (1, C)  key-side bias (kept)
    w_big = jnp.concatenate([p["wv"], wqk], axis=1)       # (C, 2C)
    b_big = jnp.concatenate([p["bv"], bqk], axis=1)       # (1, 2C)
    return w_big.T, b_big.T                               # (2C, C), (2C, 1)


# ----------------------------------------------------------------------------
# Parameter construction (deterministic, synthetic)
# ----------------------------------------------------------------------------
def _xavier_uniform(key, shape, fan_in, fan_out):
    bound = float(np.sqrt(6.0 / (fan_in + fan_out)))
    return jax.random.uniform(key, shape, jnp.float32, -bound, bound)


def init_attention_params(key, C):
    C8 = C // 8
    ks = jax.random.split(key, 6)
    inv_sqrt_c = 1.0 / float(np.sqrt(C))
    return {
        "wq": _xavier_uniform(ks[0], (C, C8), C, C8),
        "bq": jax.random.uniform(ks[1], (1, C8), jnp.float32, -inv_sqrt_c, inv_sqrt_c),
        "wk": _xavier_uniform(ks[2], (C, C8), C, C8),
        "bk": jax.random.uniform(ks[3], (1, C8), jnp.float32, -inv_sqrt_c, inv_sqrt_c),
        "wv": _xavier_uniform(ks[4], (C, C), C, C),
        "bv": jax.random.uniform(ks[5], (1, C), jnp.float32, -inv_sqrt_c, inv_sqrt_c),
        # Reference init leaves gamma at 0 (output would trivially equal x1); use a
        # deterministic nonzero value so the attention path is actually exercised.
        "gamma": jnp.full((1, 1), 0.5, jnp.float32),
    }


def init_adjust_trans_params(key, n_layers, feature_size):
    h_feat, w_feat, C = feature_size
    k_h, k_w, k_layers = jax.random.split(key, 3)
    layer_keys = jax.random.split(k_layers, n_layers * 2)
    layers = [
        (init_attention_params(layer_keys[2 * i], C),
         init_attention_params(layer_keys[2 * i + 1], C))
        for i in range(n_layers)
    ]
    return {
        "embedding_h": _xavier_uniform(k_h, (h_feat, C // 2), h_feat, C // 2),
        "embedding_w": _xavier_uniform(k_w, (w_feat, C // 2), w_feat, C // 2),
        "layers": layers,
    }


def _position_embedding(params, H, W, C):
    embed_h = params["embedding_h"][:H]            # (H, C//2) = Embedding(arange(H))
    embed_w = params["embedding_w"][:W]            # (W, C//2)
    return jnp.concatenate(
        [jnp.broadcast_to(embed_w[None, :, :], (H, W, C // 2)),
         jnp.broadcast_to(embed_h[:, None, :], (H, W, C // 2))], axis=-1)   # (H, W, C)


# ----------------------------------------------------------------------------
# Adjust_Trans forward: ONE pallas_call for both images (last layer only).
# ----------------------------------------------------------------------------
def adjust_trans_forward(imgA, imgB, params):
    """imgA/imgB: NCHW (B, C, H, W), like the PyTorch module. Returns NCHW pair."""
    B, C, H, W = imgA.shape
    if LENGTH < H or LENGTH < W:
        # TODO(synk): the length < spatial masking branch is not implemented (the
        # reference multiplies (B*W,H,C//8) by a (B*W,H,H) mask, which only broadcasts
        # when C//8 == H/W).
        raise NotImplementedError("length < spatial masking branch not implemented")

    HW, N = H * W, B * H * W

    # Only the LAST layer's outputs are returned by the reference forward (every layer
    # re-attends the original pos-embedded inputs) -> earlier layers are dead work.
    pa, pb = params["layers"][-1]

    pos = _position_embedding(params, H, W, C)                        # (H, W, C)
    pos_cm = jnp.tile(jnp.transpose(pos.reshape(HW, C)), (1, B))      # (C, N)

    def to_cm(img):                                                   # NCHW -> (C, B*HW)
        return jnp.transpose(img.reshape(B, C, HW), (1, 0, 2)).reshape(C, N)

    x_all = jnp.stack([to_cm(imgA), to_cm(imgB)])                     # (2, C, N)
    wA, bA = _fold_attention_params(pa)
    wB, bB = _fold_attention_params(pb)
    w_all = jnp.stack([wA, wB])                                       # (2, 2C, C)
    b_all = jnp.stack([bA, bB])                                       # (2, 2C, 1)
    gamma_all = jnp.concatenate([pa["gamma"], pb["gamma"]], axis=0)   # (2, 1)
    bias = _criss_cross_bias(B, H, W)                                 # (N, N) static

    n_inst = 2
    out = pl.pallas_call(
        _ala_fused_kernel,
        out_shape=jax.ShapeDtypeStruct((n_inst, C, N), jnp.float32),
        grid=(n_inst,),
        in_specs=[
            pl.BlockSpec((1, C, N), lambda i: (i, 0, 0)),             # x (per instance)
            pl.BlockSpec((C, N), lambda i: (0, 0)),                   # pos (shared, no re-DMA)
            pl.BlockSpec((1, 2 * C, C), lambda i: (i, 0, 0)),         # folded weights
            pl.BlockSpec((1, 2 * C, 1), lambda i: (i, 0, 0)),         # folded biases
            pl.BlockSpec((N, N), lambda i: (0, 0)),                   # criss-cross mask (shared)
            pl.BlockSpec(memory_space=pltpu.MemorySpace.SMEM),        # gamma scalars
        ],
        out_specs=pl.BlockSpec((1, C, N), lambda i: (i, 0, 0)),
        compiler_params=pltpu.CompilerParams(dimension_semantics=("parallel",)),
    )(x_all, pos_cm, w_all, b_all, bias, gamma_all)

    def from_cm(o):                                                   # (C, N) -> NCHW
        return jnp.transpose(o.reshape(C, B, H, W), (1, 0, 2, 3))

    return from_cm(out[0]), from_cm(out[1])


# ----------------------------------------------------------------------------
# Pure-JAX reference (sanity check only) — concat formulation + full layer loop,
# exactly as the PyTorch module.
# ----------------------------------------------------------------------------
def _ala_reference(x_nhwc, p):
    B, H, W, C = x_nhwc.shape
    q = jnp.einsum("bhwc,cd->bhwd", x_nhwc, p["wq"]) + p["bq"][0]
    k = jnp.einsum("bhwc,cd->bhwd", x_nhwc, p["wk"]) + p["bk"][0]
    v = jnp.einsum("bhwc,cd->bhwd", x_nhwc, p["wv"]) + p["bv"][0]
    eH = jnp.einsum("bhwc,bgwc->bhwg", q, k)
    eye = jnp.eye(H, dtype=bool)
    eH = jnp.where(eye[None, :, None, :], -jnp.inf, eH)
    eW = jnp.einsum("bhwc,bhgc->bhwg", q, k)
    att = jax.nn.softmax(jnp.concatenate([eH, eW], axis=-1), axis=-1)
    attH, attW = att[..., :H], att[..., H:]
    outH = jnp.einsum("bhwg,bgwc->bhwc", attH, v)
    outW = jnp.einsum("bhwg,bhgc->bhwc", attW, v)
    return p["gamma"][0, 0] * (outH + outW) + x_nhwc


def adjust_trans_reference(imgA, imgB, params):
    B, C, H, W = imgA.shape
    pos = _position_embedding(params, H, W, C)
    a = jnp.transpose(imgA, (0, 2, 3, 1)) + pos[None]
    b = jnp.transpose(imgB, (0, 2, 3, 1)) + pos[None]
    fea_a = fea_b = None
    for pa, pb in params["layers"]:
        fea_a = _ala_reference(a, pa)
        fea_b = _ala_reference(b, pb)
    return (jnp.transpose(fea_a, (0, 3, 1, 2)),
            jnp.transpose(fea_b, (0, 3, 1, 2)))


# ----------------------------------------------------------------------------
if __name__ == "__main__":
    key = jax.random.PRNGKey(0)
    B, C, H, W = 2, 32, 8, 8          # length=8 >= H, W  -> no masking branch
    n_layers = 2
    feature_size = (H, W, C)

    k_p, k_a, k_b = jax.random.split(key, 3)
    params = init_adjust_trans_params(k_p, n_layers, feature_size)
    imgA = jax.random.normal(k_a, (B, C, H, W), jnp.float32)
    imgB = jax.random.normal(k_b, (B, C, H, W), jnp.float32)

    fea_a, fea_b = adjust_trans_forward(imgA, imgB, params)
    jax.block_until_ready((fea_a, fea_b))

    ref_a, ref_b = adjust_trans_reference(imgA, imgB, params)
    err_a = float(jnp.max(jnp.abs(fea_a - ref_a))) / (float(jnp.max(jnp.abs(ref_a))) + 1e-6)
    err_b = float(jnp.max(jnp.abs(fea_b - ref_b))) / (float(jnp.max(jnp.abs(ref_b))) + 1e-6)
    assert err_a < 1e-2 and err_b < 1e-2, (err_a, err_b)

    print("KERNEL_OK")
</pallas_src>

<mosaic_0001>
module attributes {stable_mosaic.version = 11 : i64} {
  func.func @_ala_fused_kernel(%arg0: i32, %arg1: memref<1x32x128xf32, #tpu.memory_space<vmem>>, %arg2: memref<32x128xf32, #tpu.memory_space<vmem>>, %arg3: memref<1x64x32xf32, #tpu.memory_space<vmem>>, %arg4: memref<1x64x1xf32, #tpu.memory_space<vmem>>, %arg5: memref<128x128xf32, #tpu.memory_space<vmem>>, %arg6: memref<2x1xf32, #tpu.memory_space<smem>>, %arg7: memref<1x32x128xf32, #tpu.memory_space<vmem>>) attributes {dimension_semantics = [#tpu.dimension_semantics<parallel>], iteration_bounds = array<i64: 2>, scalar_prefetch = 0 : i64, scratch_operands = 0 : i64, tpu.core_type = #tpu.core_type<tc>, window_params = [{transform_indices = @transform_0, window_bounds = array<i64: 1, 32, 128>}, {pipeline_mode = #tpu.pipeline_mode<synchronous>, transform_indices = @transform_1, window_bounds = array<i64: 32, 128>}, {transform_indices = @transform_2, window_bounds = array<i64: 1, 64, 32>}, {transform_indices = @transform_3, window_bounds = array<i64: 1, 64, 1>}, {pipeline_mode = #tpu.pipeline_mode<synchronous>, transform_indices = @transform_4, window_bounds = array<i64: 128, 128>}, {transform_indices = @transform_5, window_bounds = array<i64: 2, 1>}, {transform_indices = @transform_6, window_bounds = array<i64: 1, 32, 128>}]} {
    %c0 = arith.constant 0 : index
    %c0_0 = arith.constant 0 : index
    %c0_1 = arith.constant 0 : index
    %0 = vector.load %arg1[%c0, %c0_0, %c0_1] : memref<1x32x128xf32, #tpu.memory_space<vmem>>, vector<1x32x128xf32>
    %1 = vector.shape_cast %0 : vector<1x32x128xf32> to vector<32x128xf32>
    %c0_2 = arith.constant 0 : index
    %c0_3 = arith.constant 0 : index
    %2 = vector.load %arg2[%c0_2, %c0_3] : memref<32x128xf32, #tpu.memory_space<vmem>>, vector<32x128xf32>
    %3 = arith.addf %1, %2 : vector<32x128xf32>
    %c0_4 = arith.constant 0 : index
    %c0_5 = arith.constant 0 : index
    %c0_6 = arith.constant 0 : index
    %4 = vector.load %arg3[%c0_4, %c0_5, %c0_6] : memref<1x64x32xf32, #tpu.memory_space<vmem>>, vector<1x64x32xf32>
    %5 = vector.shape_cast %4 : vector<1x64x32xf32> to vector<64x32xf32>
    %cst = arith.constant dense<0.000000e+00> : vector<64x128xf32>
    %6 = tpu.matmul %5, %3, %cst {dimension_numbers = #tpu.dot_dimension_numbers<[1], [0], [0], [1], [0, 0, 1, 1], [], []>} : vector<64x32xf32>, vector<32x128xf32>, vector<64x128xf32> -> vector<64x128xf32>
    %c0_7 = arith.constant 0 : index
    %c0_8 = arith.constant 0 : index
    %c0_9 = arith.constant 0 : index
    %7 = vector.load %arg4[%c0_7, %c0_8, %c0_9] : memref<1x64x1xf32, #tpu.memory_space<vmem>>, vector<1x64x1xf32>
    %8 = vector.shape_cast %7 : vector<1x64x1xf32> to vector<64x1xf32>
    %9 = vector.broadcast %8 : vector<64x1xf32> to vector<64x128xf32>
    %10 = arith.addf %6, %9 : vector<64x128xf32>
    %11 = vector.extract_strided_slice %10 {offsets = [0, 0], sizes = [32, 128], strides = [1, 1]} : vector<64x128xf32> to vector<32x128xf32>
    %12 = vector.extract_strided_slice %10 {offsets = [32, 0], sizes = [32, 128], strides = [1, 1]} : vector<64x128xf32> to vector<32x128xf32>
    %cst_10 = arith.constant dense<0.000000e+00> : vector<128x128xf32>
    %13 = tpu.matmul %12, %3, %cst_10 {dimension_numbers = #tpu.dot_dimension_numbers<[0], [0], [1], [1], [0, 1, 1, 1], [], []>} : vector<32x128xf32>, vector<32x128xf32>, vector<128x128xf32> -> vector<128x128xf32>
    %c0_11 = arith.constant 0 : index
    %c0_12 = arith.constant 0 : index
    %14 = vector.load %arg5[%c0_11, %c0_12] : memref<128x128xf32, #tpu.memory_space<vmem>>, vector<128x128xf32>
    %15 = arith.addf %13, %14 : vector<128x128xf32>
    %cst_13 = arith.constant dense<0xFF800000> : vector<128xf32>
    %16 = vector.multi_reduction <maximumf>, %15, %cst_13 [1] : vector<128x128xf32> to vector<128xf32>
    %17 = vector.shape_cast %16 : vector<128xf32> to vector<128x1xf32>
    %18 = vector.broadcast %17 : vector<128x1xf32> to vector<128x128xf32>
    %19 = arith.subf %15, %18 : vector<128x128xf32>
    %20 = math.exp %19 : vector<128x128xf32>
    %cst_14 = arith.constant dense<0.000000e+00> : vector<128xf32>
    %21 = vector.multi_reduction <add>, %20, %cst_14 [1] : vector<128x128xf32> to vector<128xf32>
    %22 = vector.shape_cast %21 : vector<128xf32> to vector<128x1xf32>
    %23 = tpu.reciprocal %22 {approx = true} : vector<128x1xf32> -> vector<128x1xf32>
    %24 = vector.broadcast %23 : vector<128x1xf32> to vector<128x128xf32>
    %25 = arith.mulf %20, %24 : vector<128x128xf32>
    %cst_15 = arith.constant dense<0.000000e+00> : vector<32x128xf32>
    %26 = tpu.matmul %11, %25, %cst_15 {dimension_numbers = #tpu.dot_dimension_numbers<[1], [1], [0], [0], [0, 0, 1, 0], [], []>} : vector<32x128xf32>, vector<128x128xf32>, vector<32x128xf32> -> vector<32x128xf32>
    %27 = arith.index_cast %arg0 : i32 to index
    %c0_16 = arith.constant 0 : index
    %28 = memref.load %arg6[%27, %c0_16] : memref<2x1xf32, #tpu.memory_space<smem>>
    %29 = vector.broadcast %28 : f32 to vector<32x128xf32>
    %30 = arith.mulf %29, %26 : vector<32x128xf32>
    %31 = arith.addf %30, %3 : vector<32x128xf32>
    %c0_17 = arith.constant 0 : index
    %c0_18 = arith.constant 0 : index
    %c0_19 = arith.constant 0 : index
    %32 = vector.load %arg7[%c0_17, %c0_18, %c0_19] : memref<1x32x128xf32, #tpu.memory_space<vmem>>, vector<1x32x128xf32>
    %33 = vector.shape_cast %32 : vector<1x32x128xf32> to vector<32x128xf32>
    %34 = vector.shape_cast %31 : vector<32x128xf32> to vector<1x32x128xf32>
    tpu.vector_store %arg7[%c0_17, %c0_18, %c0_19], %34 {strides = array<i32>} : memref<1x32x128xf32, #tpu.memory_space<vmem>>, vector<1x32x128xf32>,
    return
  }
  func.func @transform_0(%arg0: i32) -> (i32, i32, i32) {
    %c0_i32 = arith.constant 0 : i32
    %c0_i32_0 = arith.constant 0 : i32
    %c0_i32_1 = arith.constant 0 : i32
    return %arg0, %c0_i32, %c0_i32_0 : i32, i32, i32
  }
  func.func @transform_1(%arg0: i32) -> (i32, i32) {
    %c0_i32 = arith.constant 0 : i32
    %c0_i32_0 = arith.constant 0 : i32
    %c0_i32_1 = arith.constant 0 : i32
    return %c0_i32, %c0_i32_0 : i32, i32
  }
  func.func @transform_2(%arg0: i32) -> (i32, i32, i32) {
    %c0_i32 = arith.constant 0 : i32
    %c0_i32_0 = arith.constant 0 : i32
    %c0_i32_1 = arith.constant 0 : i32
    return %arg0, %c0_i32, %c0_i32_0 : i32, i32, i32
  }
  func.func @transform_3(%arg0: i32) -> (i32, i32, i32) {
    %c0_i32 = arith.constant 0 : i32
    %c0_i32_0 = arith.constant 0 : i32
    %c0_i32_1 = arith.constant 0 : i32
    return %arg0, %c0_i32, %c0_i32_0 : i32, i32, i32
  }
  func.func @transform_4(%arg0: i32) -> (i32, i32) {
    %c0_i32 = arith.constant 0 : i32
    %c0_i32_0 = arith.constant 0 : i32
    %c0_i32_1 = arith.constant 0 : i32
    return %c0_i32, %c0_i32_0 : i32, i32
  }
  func.func @transform_5(%arg0: i32) -> (i32, i32) {
    %c0_i32 = arith.constant 0 : i32
    %c0_i32_0 = arith.constant 0 : i32
    %c0_i32_1 = arith.constant 0 : i32
    return %c0_i32, %c0_i32_0 : i32, i32
  }
  func.func @transform_6(%arg0: i32) -> (i32, i32, i32) {
    %c0_i32 = arith.constant 0 : i32
    %c0_i32_0 = arith.constant 0 : i32
    %c0_i32_1 = arith.constant 0 : i32
    return %arg0, %c0_i32, %c0_i32_0 : i32, i32, i32
  }
}

</mosaic_0001>

<bundles_post_ra>
// kernel: tpu_custom_call.1
= control target key start
LH: loop header
LB: loop body
LE: loop exit
PB: predicated region body
PF: predicated region fallthrough
CT: control target
= control target key end

     0   :  { %11 = vsyncpa [#allocation4], 0  ;;  %s1967_s0 = inlined_call_operand.vmem [shape: f32[2,32,128], index: 0, kind: input, shape index: {}]   ;;  %s1968_s1 = inlined_call_operand.vmem [shape: f32[32,128], index: 1, kind: input, shape index: {}]   ;;  %s1969_s2 = inlined_call_operand.vmem [shape: f32[2,64,32], index: 2, kind: input, shape index: {}]   ;;  %s1970_s3 = inlined_call_operand.vmem [shape: f32[2,64,1], index: 3, kind: input, shape index: {}]   ;;  %s1971_s4 = inlined_call_operand.vmem [shape: f32[128,128], index: 4, kind: input, shape index: {}]   ;;  %s1972_s5 = inlined_call_operand.vmem [shape: f32[2,1], index: 5, kind: input, shape index: {}]   ;;  %s1973_s6 = inlined_call_operand.hbm [shape: f32[2,32,128], index: 6, kind: output, shape index: {}]  }
   0x1   :  { %12 = vsyncpa [#allocation3], 0 }
   0x2   :  { %14 = vsyncpa [#allocation3 + $0x1], 0  ;;  %s1579_s21 = smov 0   ;;  %s1581_s22 = smov 0  }
   0x3   :  { %s1583_s23 = smov 0   ;;  %s1585_s24 = smov 0  }
   0x4 LB: > { %s1600_s25 = sadd.s32 4294967295, %s1537_s24   ;;  %s1099_s26 = sadd.s32 4294967294, %s1537_s24   ;;  %s1537_s24 = sphi %s1585_s24, %s1980_s24   ;;  %s1533_s23 = sphi %s1583_s23, %s1979_s23   ;;  %s1529_s22 = sphi %s1581_s22, %s1978_s22   ;;  %s1525_s21 = sphi %s1579_s21, %s1977_s21  }
   0x5   : > { %s1604_s27 = sadd.s32 1, %s1537_s24   ;;  %s168_s28 = sadd.s32 1, %s1533_s23 }
   0x6   : > { %s165_s29 = ssub.s32 %s1537_s24, %s1604_s27  ;;  %p178_p0 = scmp.ne.s32.totalorder %s1533_s23, %s1529_s22 }
   0x7   : > { %p166_p1 = scmp.eq.s32.totalorder %s165_s29, 0  ;;  %p179_p2 = scmp.eq.s32.totalorder %s1600_s25, 1 }
   0x8   : > { %p184_p3 = scmp.ne.s32.totalorder %s1529_s22, %s1525_s21  ;;  %p185_p4 = scmp.eq.s32.totalorder %s1099_s26, 1 }
   0x9   : > { %s1615_s30 = scalar_select %p166_p1, %s1533_s23, %s168_s28  }
   0xa   : > { %p1617_p5 = por %p179_p2, %p178_p0  ;;  %p1621_p6 = por %p185_p4, %p184_p3 }
   0xb   : > { %p1100_p7 = scmp.ge.s32.totalorder %s1537_s24, 1  ;;  %p192_p8 = scmp.lt.s32.totalorder %s1537_s24, 3 }
   0xc   : > { %p1350_p9 = scmp.eq.s32.totalorder %s1600_s25, 0  ;;  %s211_s12 = sshll.u32 %s1972_s5, 4  ;;  %s212_s12 = int_to_ptr.vmem [resolvable:$true] %s211_s12 }
   0xd   : > { %p1628_p10 = pnand %p1100_p7, %p192_p8  ;;  %s1456_s13 = scalar_lea.vmem %s212_s12, 32 }
   0xe   : > { %p1457_p13 = scmp.ne.s32.totalorder %s212_s12, %s1456_s13  ;;  %p1464_p3 = scmp.lt.s32.totalorder %s212_s12, %s212_s12 }
   0xf   : > { %p1342_p11 = pneg %p1628_p10  ;;  %p1465_p4 = scmp.lt.s32.totalorder %s1456_s13, %s1456_s13 }
  0x11   : > { %p1343_p12 = pnand %p1350_p9, %p1342_p11  ;;  %p1466_p7 = por %p1465_p4, %p1464_p3 }
  0x13   : > { %p1458_p0 = pneg %p1343_p12 }
  0x15   : > { %p1459_p1 = pnand %p1458_p0, %p1457_p13 }
  0x17   : > { %p1460_p2 = pneg %p1459_p1 }
  0x19   : > { %p1467_p8 = pnand %p1466_p7, %p1460_p2 }
  0x1b   : > { %1470 = shalt.err (!%p1467_p8)
}
  0x1c   : > { %s1539_s14 = smov [#allocation2]   ;;  %248 = sbr.rel (%p1628_p10) target bundleno = 1335 (0x537), region = 44 }
  0x1d   : > { %1345 = dma.vmem_to_smem (!%p1343_p12), %s212_s12, 32, %s1539_s14, [#allocation4]  }
  0x23   : > { %1516 = dma.done.wait (%p1350_p9), [#allocation4], 32  }
  0x24   : > { %1518 = vsyncadd (%p1350_p9), [#allocation4], 4294967264 }
  0x25   : > { %254 = sfence }
  0x26   : > { %p289_p11 = scmp.lt.s32.totalorder %s1600_s25, 1  ;;  %v1540_v0 = vmov 0   ;;  %v308_v1 = vld [vmem:[%s1968_s1] sm:$0xff]  ;;  %v309_v2 = vld [vmem:[%s1968_s1 + $0x8] sm:$0xff]  ;;  %v310_v3 = vld [vmem:[%s1968_s1 + $0x10] sm:$0xff]  ;;  %vm372_vm0 = vcmask 261120  }
  0x27   : > { %1390 = vset.pattern.permute.xlu0 %v1540_v0  ;;  %1391 = vset.pattern.permute.xlu1 %v1540_v0  ;;  %v311_v4 = vld [vmem:[%s1968_s1 + $0x18] sm:$0xff]  ;;  %v503_v59 = vld [vmem:[%s1971_s4 + $0x8] sm:$0xff]  ;;  %v502_v63 = vld [vmem:[%s1971_s4] sm:$0xff]  ;;  %s286_s10 = sand.u32 1, %s1529_s22   ;;  %s1145_s14 = sshll.u32 %s1600_s25, 9 }
  0x28   : > { %s290_s15 = scalar_select %p289_p11, %s1600_s25, 1 }
  0x29   : > { %s1541_s20 = smov [#allocation5]  }
  0x2a   : > { %s1142_s16 = sshll.u32 %s290_s15, 5  ;;  %s1143_s29 = sshll.u32 %s290_s15, 6 }
  0x2b   : > { %s293_s11 = scalar_lea.vmem %s1967_s0, %s1142_s16  ;;  %s1665_s18 = scalar_lea.vmem %s1969_s2, %s1143_s29 }
  0x2c   : > { %v304_v5 = vld [vmem:[%s293_s11] sm:$0xff]  ;;  %v305_v6 = vld [vmem:[%s293_s11 + $0x8] sm:$0xff]  ;;  %v306_v7 = vld [vmem:[%s293_s11 + $0x10] sm:$0xff]  ;;  %s1677_s19 = scalar_lea.vmem %s1970_s3, %s1143_s29  ;;  %s1923_s15 = scalar_lea.hbm %s1973_s6, %s1145_s14 }
  0x2d   : > { %v1667_v8 = vadd.f32 %v308_v1, %v304_v5  ;;  %v1669_v9 = vadd.f32 %v309_v2, %v305_v6  ;;  %v307_v10 = vld [vmem:[%s293_s11 + $0x18] sm:$0xff]  ;;  %v1671_v11 = vadd.f32 %v310_v3, %v306_v7  ;;  %v316_v12 = vld [vmem:[%s1665_s18] sm:$0xff]  ;;  %v330_v17 = vld [vmem:[%s1677_s19 + $0x30] sm:$0xff]  ;;  %s1105_s11 = sshll.u32 %s286_s10, 5  ;;  %s1475_s26 = sshll.u32 %s1541_s20, 4  ;;  %s1476_s26 = int_to_ptr.vmem [resolvable:$false] %s1475_s26 }
  0x2e   : > { %v1679_v13 = vadd.f32 %v311_v4, %v307_v10  ;;  %1206 = vmatprep.mubr.msk.f32.mxu1 %vm372_vm0, %v316_v12  ;;  %v328_v16 = vld [vmem:[%s1677_s19 + $0x20] sm:$0xff]  ;;  %v329_v18 = vld [vmem:[%s1677_s19 + $0x28] sm:$0xff]  ;;  %364 = vperm.xlu1 %1391, %v330_v17   ;;  %v331_v19 = vld [vmem:[%s1677_s19 + $0x38] sm:$0xff]  ;;  %s288_s12 = scalar_lea.vmem [#allocation5], %s1105_s11  ;;  %s1477_s28 = scalar_lea.vmem %s1476_s26, 1024 }
  0x2f   : > { %v1288_v14 = vpack.c.bf16 %v1669_v9, %v1667_v8  ;;  %354 = vperm.xlu0 %1390, %v328_v16   ;;  %v317_v20 = vld [vmem:[%s1665_s18 + $0x8] sm:$0xff]  ;;  %v318_v21 = vld [vmem:[%s1665_s18 + $0x10] sm:$0xff]  ;;  %v319_v22 = vld [vmem:[%s1665_s18 + $0x18] sm:$0xff]  ;;  %s1001_s13 = sshll.u32 %s288_s12, 4  ;;  %s1917_s13 = int_to_ptr.vmem [resolvable:$true] %s1001_s13 }
  0x30   : > { %v1292_v15 = vpack.c.bf16 %v1679_v13, %v1671_v11  ;;  %v320_v23 = vld [vmem:[%s1665_s18 + $0x20] sm:$0xff]  ;;  %v321_v24 = vld [vmem:[%s1665_s18 + $0x28] sm:$0xff]  ;;  %v322_v25 = vld [vmem:[%s1665_s18 + $0x30] sm:$0xff]  ;;  %s1471_s16 = scalar_lea.vmem %s1917_s13, 512  ;;  %p1478_p13 = scmp.lt.s32.totalorder %s1917_s13, %s1476_s26 }
  0x31   : > { %1289 = vmatprep.subr.bf16.mxu1 %v1288_v14  ;;  %v323_v26 = vld [vmem:[%s1665_s18 + $0x38] sm:$0xff]  ;;  %v504_v2 = vld [vmem:[%s1971_s4 + $0x10] sm:$0xff]  ;;  %v507_v7 = vld [vmem:[%s1971_s4 + $0x28] sm:$0xff]  ;;  %p1472_p9 = scmp.ne.s32.totalorder %s1917_s13, %s1471_s16  ;;  %p1479_p0 = scmp.lt.s32.totalorder %s1477_s28, %s1471_s16 }
  0x32   : > { %1291 = vmatpush3.bf16.msra.mxu1 %v1288_v14  ;;  %369 = vperm.xlu1 %1391, %v331_v19   ;;  %v505_v1 = vld [vmem:[%s1971_s4 + $0x18] sm:$0xff] }
  0x33   : > { %1293 = vmatprep.subr.bf16.mxu1 %v1292_v15  ;;  %359 = vperm.xlu0 %1390, %v329_v18   ;;  %v509_v17 = vld [vmem:[%s1971_s4 + $0x38] sm:$0xff]  ;;  %p1473_p10 = pnand %p1472_p9, %p1617_p5  ;;  %p1480_p1 = por %p1479_p0, %p1478_p13 }
  0x35   : > { %p1474_p12 = pneg %p1473_p10 }
  0x36   : > { %1295 = vmatpush3.bf16.msra.mxu1 %v1292_v15 }
  0x37   : > { %1297 = vmatprep.subr.bf16.mxu1 %v1288_v14  ;;  %p1481_p2 = pnand %p1480_p1, %p1474_p12 }
  0x39   : > { %1207 = vmatmul.mubr.msk.f32.vlgmr.msra.gmra.mrb[0].mxu1 %vm372_vm0, %v317_v20 }
  0x3a   : > { %1209 = vmatprep.mubr.msk.f32.mxu1 %vm372_vm0, %v318_v21  ;;  %1299 = vmatpush3.bf16.msra.mxu1 %v1288_v14  ;;  %v508_v21 = vld [vmem:[%s1971_s4 + $0x30] sm:$0xff] }
  0x3b   : > { %1301 = vmatprep.subr.bf16.mxu1 %v1292_v15 }
  0x3d   : > { %1210 = vmatmul.mubr.msk.f32.gmra.mrb[2].mxu1 %vm372_vm0, %v319_v22 }
  0x3e   : > { %1212 = vmatprep.mubr.msk.f32.mxu1 %vm372_vm0, %v320_v23  ;;  %1303 = vmatpush3.bf16.msra.mxu1 %v1292_v15  ;;  %v506_v15 = vld [vmem:[%s1971_s4 + $0x20] sm:$0xff]  ;;  %v511_v23 = vld [vmem:[%s1971_s4 + $0x48] sm:$0xff] }
  0x41   : > { %1213 = vmatmul.mubr.msk.f32.gmra.mrb[4].mxu1 %vm372_vm0, %v321_v24 }
  0x42   : > { %1215 = vmatprep.mubr.msk.f32.mxu1 %vm372_vm0, %v322_v25 }
  0x45   : > { %1216 = vmatmul.mubr.msk.f32.gmra.mrb[6].mxu1 %vm372_vm0, %v323_v26 }
  0xad   : > { %v365_v37 = vpop.permute.xlu1 %364 }
  0xae   : > { %v355_v30 = vpop.permute.xlu0 %354 }
  0xb1   : > { %v370_v41 = vpop.permute.xlu1 %369 }
  0xb2   : > { %v360_v35 = vpop.permute.xlu0 %359 }
 0x10c   : > { %v1704_v27 = vpop.f32.mrb[0].mxu1 }
 0x10d   : > { %v1706_v28 = vpop.f32.mrb[1].mxu1 }
 0x110   : > { %v1708_v29 = vpop.f32.mrb[2].mxu1 }
 0x111   : > { %v1710_v31 = vpop.f32.mrb[3].mxu1 }
 0x114   : > { %v1214_v32 = vpop.f32.mrb[4].mxu1 }
 0x115   : > { %v483_v33 = vpop.f32.mrb[5].mxu1  ;;  %v489_v39 = vadd.f32 %v1214_v32, %v360_v35 }
 0x116   : > { %v484_v34 = vadd.f32 %v483_v33, %v355_v30  ;;  %v510_v30 = vld [vmem:[%s1971_s4 + $0x40] sm:$0xff]  ;;  %v513_v33 = vld [vmem:[%s1971_s4 + $0x58] sm:$0xff] }
 0x118   : > { %518 = vxpose.xlu0.b32.start [1/4] (short) %v484_v34, 128  ;;  %v1217_v36 = vpop.f32.mrb[6].mxu1 }
 0x119   : > { %v493_v38 = vpop.f32.mrb[7].mxu1  ;;  %v499_v42 = vadd.f32 %v1217_v36, %v370_v41  ;;  %v514_v41 = vld [vmem:[%s1971_s4 + $0x60] sm:$0xff] }
 0x11a   : > { %v494_v40 = vadd.f32 %v493_v38, %v365_v37  ;;  %v512_v37 = vld [vmem:[%s1971_s4 + $0x50] sm:$0xff] }
 0x11c   : > { %519 = vxpose.xlu0.b32.cont [2/4] (short) %v489_v39, 128  ;;  %v515_v39 = vld [vmem:[%s1971_s4 + $0x68] sm:$0xff] }
 0x120   : > { %520 = vxpose.xlu0.b32.cont [3/4] (short) %v494_v40, 128 }
 0x124   : > { %521 = vxpose.xlu0.b32.end [4/4] (short) %v499_v42, 128 }
 0x198   : > { %v534_v43 = vpop.trf.xlu0 }
 0x199   : > { %1226 = vmatprep.mubr.msk.f32.mxu1 %vm372_vm0, %v534_v43 }
 0x19c   : > { %v535_v44 = vpop.trf.xlu0 }
 0x19d   : > { %1227 = vmatmul.mubr.msk.f32.vlgmr.msra.gmra.mrb[8].mxu1 %vm372_vm0, %v535_v44 }
 0x1a0   : > { %v536_v45 = vpop.trf.xlu0 }
 0x1a1   : > { %1229 = vmatprep.mubr.msk.f32.mxu1 %vm372_vm0, %v536_v45  ;;  %v517_v45 = vld [vmem:[%s1971_s4 + $0x78] sm:$0xff] }
 0x1a4   : > { %v537_v46 = vpop.trf.xlu0 }
 0x1a5   : > { %1230 = vmatmul.mubr.msk.f32.gmra.mrb[10].mxu1 %vm372_vm0, %v537_v46 }
 0x1a8   : > { %v538_v47 = vpop.trf.xlu0 }
 0x1a9   : > { %1232 = vmatprep.mubr.msk.f32.mxu1 %vm372_vm0, %v538_v47  ;;  %v516_v47 = vld [vmem:[%s1971_s4 + $0x70] sm:$0xff] }
 0x1ac   : > { %v539_v48 = vpop.trf.xlu0 }
 0x1ad   : > { %1233 = vmatmul.mubr.msk.f32.gmra.mrb[12].mxu1 %vm372_vm0, %v539_v48 }
 0x1b0   : > { %v540_v49 = vpop.trf.xlu0 }
 0x1b1   : > { %1235 = vmatprep.mubr.msk.f32.mxu1 %vm372_vm0, %v540_v49 }
 0x1b4   : > { %v541_v50 = vpop.trf.xlu0 }
 0x1b5   : > { %1236 = vmatmul.mubr.msk.f32.gmra.mrb[14].mxu1 %vm372_vm0, %v541_v50 }
 0x1b8   : > { %v542_v51 = vpop.trf.xlu0 }
 0x1b9   : > { %1238 = vmatprep.mubr.msk.f32.mxu1 %vm372_vm0, %v542_v51 }
 0x1bc   : > { %v543_v52 = vpop.trf.xlu0 }
 0x1bd   : > { %1239 = vmatmul.mubr.msk.f32.gmra.mrb[16].mxu1 %vm372_vm0, %v543_v52 }
 0x1c0   : > { %v544_v53 = vpop.trf.xlu0 }
 0x1c1   : > { %1241 = vmatprep.mubr.msk.f32.mxu1 %vm372_vm0, %v544_v53 }
 0x1c4   : > { %v545_v54 = vpop.trf.xlu0 }
 0x1c5   : > { %1242 = vmatmul.mubr.msk.f32.gmra.mrb[18].mxu1 %vm372_vm0, %v545_v54 }
 0x1c8   : > { %v546_v55 = vpop.trf.xlu0 }
 0x1c9   : > { %1244 = vmatprep.mubr.msk.f32.mxu1 %vm372_vm0, %v546_v55 }
 0x1cc   : > { %v547_v56 = vpop.trf.xlu0 }
 0x1cd   : > { %1245 = vmatmul.mubr.msk.f32.gmra.mrb[20].mxu1 %vm372_vm0, %v547_v56 }
 0x1d0   : > { %v548_v57 = vpop.trf.xlu0 }
 0x1d1   : > { %1247 = vmatprep.mubr.msk.f32.mxu1 %vm372_vm0, %v548_v57 }
 0x1d4   : > { %v549_v58 = vpop.trf.xlu0 }
 0x1d5   : > { %1248 = vmatmul.mubr.msk.f32.gmra.mrb[22].mxu1 %vm372_vm0, %v549_v58 }
 0x270   : > { %v1228_v60 = vpop.f32.mrb[8].mxu1 }
 0x271   : > { %v1731_v61 = vadd.f32 %v1228_v60, %v503_v59  ;;  %v664_v62 = vpop.f32.mrb[9].mxu1 }
 0x272   : > { %v1737_v0 = vadd.f32 %v664_v62, %v502_v63 }
 0x273   : > { %745 = vmax.xlane.f32.xlu1 %v1731_v61 }
 0x277   : > { %743 = vmax.xlane.f32.xlu1 %v1737_v0 }
 0x278   : > { %v1231_v3 = vpop.f32.mrb[10].mxu1 }
 0x279   : > { %v1746_v4 = vadd.f32 %v1231_v3, %v505_v1  ;;  %v674_v5 = vpop.f32.mrb[11].mxu1 }
 0x27a   : > { %v1748_v6 = vadd.f32 %v674_v5, %v504_v2 }
 0x27b   : > { %749 = vmax.xlane.f32.xlu0 %v1746_v4 }
 0x27c   : > { %747 = vmax.xlane.f32.xlu1 %v1748_v6 }
 0x280   : > { %v1234_v10 = vpop.f32.mrb[12].mxu1 }
 0x281   : > { %v1755_v12 = vadd.f32 %v1234_v10, %v507_v7  ;;  %v684_v14 = vpop.f32.mrb[13].mxu1 }
 0x282   : > { %v1761_v16 = vadd.f32 %v684_v14, %v506_v15 }
 0x283   : > { %753 = vmax.xlane.f32.xlu1 %v1755_v12 }
 0x287   : > { %751 = vmax.xlane.f32.xlu1 %v1761_v16 }
 0x288   : > { %v1237_v18 = vpop.f32.mrb[14].mxu1 }
 0x289   : > { %v1767_v19 = vadd.f32 %v1237_v18, %v509_v17  ;;  %v694_v20 = vpop.f32.mrb[15].mxu1 }
 0x28a   : > { %v1773_v22 = vadd.f32 %v694_v20, %v508_v21 }
 0x28b   : > { %757 = vmax.xlane.f32.xlu1 %v1767_v19 }
 0x28f   : > { %755 = vmax.xlane.f32.xlu1 %v1773_v22 }
 0x290   : > { %v1240_v24 = vpop.f32.mrb[16].mxu1 }
 0x291   : > { %v1779_v25 = vadd.f32 %v1240_v24, %v511_v23  ;;  %v704_v26 = vpop.f32.mrb[17].mxu1 }
 0x292   : > { %v1785_v32 = vadd.f32 %v704_v26, %v510_v30 }
 0x293   : > { %761 = vmax.xlane.f32.xlu1 %v1779_v25 }
 0x297   : > { %759 = vmax.xlane.f32.xlu1 %v1785_v32 }
 0x298   : > { %v1243_v34 = vpop.f32.mrb[18].mxu1 }
 0x299   : > { %v1791_v35 = vadd.f32 %v1243_v34, %v513_v33  ;;  %v714_v36 = vpop.f32.mrb[19].mxu1 }
 0x29a   : > { %v1797_v38 = vadd.f32 %v714_v36, %v512_v37 }
 0x29b   : > { %765 = vmax.xlane.f32.xlu1 %v1791_v35 }
 0x29f   : > { %763 = vmax.xlane.f32.xlu1 %v1797_v38 }
 0x2a0   : > { %v1246_v40 = vpop.f32.mrb[20].mxu1 }
 0x2a1   : > { %v1806_v42 = vadd.f32 %v1246_v40, %v515_v39  ;;  %v724_v43 = vpop.f32.mrb[21].mxu1 }
 0x2a2   : > { %v1809_v44 = vadd.f32 %v724_v43, %v514_v41 }
 0x2a3   : > { %769 = vmax.xlane.f32.xlu1 %v1806_v42 }
 0x2a7   : > { %767 = vmax.xlane.f32.xlu1 %v1809_v44 }
 0x2a8   : > { %v1249_v46 = vpop.f32.mrb[22].mxu1 }
 0x2a9   : > { %v1818_v48 = vadd.f32 %v1249_v46, %v517_v45  ;;  %v734_v49 = vpop.f32.mrb[23].mxu1 }
 0x2aa   : > { %v1821_v50 = vadd.f32 %v734_v49, %v516_v47 }
 0x2ab   : > { %773 = vmax.xlane.f32.xlu1 %v1818_v48 }
 0x2af   : > { %771 = vmax.xlane.f32.xlu1 %v1821_v50 }
 0x300   : > { %v746_v51 = vpop.xlane.xlu1 %745 }
 0x301   : > { %v776_v52 = vsub.f32 %v1731_v61, %v746_v51 }
 0x303   : > { %v793_v53 = vmul.f32 1.442695, %v776_v52 }
 0x304   : > { %v744_v54 = vpop.xlane.xlu1 %743 }
 0x305   : > { %1392 = vpow2.f32 %v793_v53  ;;  %v775_v55 = vsub.f32 %v1737_v0, %v744_v54 }
 0x307   : > { %v791_v56 = vmul.f32 1.442695, %v775_v55  ;;  %v324_v55 = vld [vmem:[%s1677_s19] sm:$0xff] }
 0x308   : > { %v750_v57 = vpop.xlane.xlu0 %749 }
 0x309   : > { %1394 = vpow2.f32 %v791_v56  ;;  %v778_v58 = vsub.f32 %v1746_v4, %v750_v57  ;;  %v748_v59 = vpop.xlane.xlu1 %747  ;;  %v325_v56 = vld [vmem:[%s1677_s19 + $0x8] sm:$0xff] }
 0x30a   : > { %v777_v60 = vsub.f32 %v1748_v6, %v748_v59  ;;  %v326_v59 = vld [vmem:[%s1677_s19 + $0x10] sm:$0xff] }
 0x30b   : > { %v797_v62 = vmul.f32 1.442695, %v778_v58 }
 0x30c   : > { %v795_v63 = vmul.f32 1.442695, %v777_v60 }
 0x30d   : > { %1396 = vpow2.f32 %v797_v62 }
 0x30e   : > { %1398 = vpow2.f32 %v795_v63 }
 0x30f   : > { %v1828_v1 = vpop.eup %1392 }
 0x310   : > { %v754_v2 = vpop.xlane.xlu1 %753  ;;  %825 = vadd.xlane.f32.xlu1 %v1828_v1 }
 0x311   : > { %v780_v61 = vsub.f32 %v1755_v12, %v754_v2 }
 0x313   : > { %v1832_v0 = vpop.eup %1394  ;;  %v801_v3 = vmul.f32 1.442695, %v780_v61 }
 0x314   : > { %v752_v5 = vpop.xlane.xlu1 %751  ;;  %823 = vadd.xlane.f32.xlu1 %v1832_v0 }
 0x315   : > { %1400 = vpow2.f32 %v801_v3  ;;  %v779_v4 = vsub.f32 %v1761_v16, %v752_v5 }
 0x317   : > { %v1836_v6 = vpop.eup %1396  ;;  %v799_v7 = vmul.f32 1.442695, %v779_v4 }
 0x318   : > { %v758_v10 = vpop.xlane.xlu1 %757  ;;  %829 = vadd.xlane.f32.xlu1 %v1836_v6  ;;  %v1840_v15 = vpop.eup %1398 }
 0x319   : > { %1402 = vpow2.f32 %v799_v7  ;;  %v782_v14 = vsub.f32 %v1767_v19, %v758_v10 }
 0x31b   : > { %v805_v12 = vmul.f32 1.442695, %v782_v14 }
 0x31c   : > { %v756_v17 = vpop.xlane.xlu1 %755  ;;  %827 = vadd.xlane.f32.xlu1 %v1840_v15 }
 0x31d   : > { %1404 = vpow2.f32 %v805_v12  ;;  %v781_v18 = vsub.f32 %v1773_v22, %v756_v17 }
 0x31f   : > { %v1844_v20 = vpop.eup %1400  ;;  %v803_v16 = vmul.f32 1.442695, %v781_v18 }
 0x320   : > { %v762_v21 = vpop.xlane.xlu1 %761  ;;  %833 = vadd.xlane.f32.xlu1 %v1844_v20 }
 0x321   : > { %1406 = vpow2.f32 %v803_v16  ;;  %v784_v23 = vsub.f32 %v1779_v25, %v762_v21  ;;  %v327_v21 = vld [vmem:[%s1677_s19 + $0x18] sm:$0xff]  ;;  %s1136_s19 = sshll.u32 %s1600_s25, 7  ;;  %s1926_s25 = scalar_lea.sflag [#allocation3], %s286_s10 }
 0x322   : > { %s973_s9 = sld [smem:[#allocation2 + %s1136_s19]] }
 0x323   : > { %v1848_v24 = vpop.eup %1402  ;;  %v809_v19 = vmul.f32 1.442695, %v784_v23 }
 0x324   : > { %v760_v26 = vpop.xlane.xlu1 %759  ;;  %831 = vadd.xlane.f32.xlu1 %v1848_v24 }
 0x325   : > { %1408 = vpow2.f32 %v809_v19  ;;  %v783_v30 = vsub.f32 %v1785_v32, %v760_v26 }
 0x327   : > { %v1852_v33 = vpop.eup %1404  ;;  %v807_v22 = vmul.f32 1.442695, %v783_v30 }
 0x328   : > { %v766_v34 = vpop.xlane.xlu1 %765  ;;  %837 = vadd.xlane.f32.xlu1 %v1852_v33 }
 0x329   : > { %1410 = vpow2.f32 %v807_v22  ;;  %v786_v36 = vsub.f32 %v1791_v35, %v766_v34 }
 0x32b   : > { %v1856_v37 = vpop.eup %1406  ;;  %v813_v25 = vmul.f32 1.442695, %v786_v36 }
 0x32c   : > { %v764_v39 = vpop.xlane.xlu1 %763  ;;  %835 = vadd.xlane.f32.xlu1 %v1856_v37 }
 0x32d   : > { %1412 = vpow2.f32 %v813_v25  ;;  %v785_v40 = vsub.f32 %v1797_v38, %v764_v39 }
 0x32f   : > { %v1860_v41 = vpop.eup %1408  ;;  %v811_v32 = vmul.f32 1.442695, %v785_v40 }
 0x330   : > { %v770_v43 = vpop.xlane.xlu1 %769  ;;  %841 = vadd.xlane.f32.xlu1 %v1860_v41 }
 0x331   : > { %1414 = vpow2.f32 %v811_v32  ;;  %v788_v45 = vsub.f32 %v1806_v42, %v770_v43 }
 0x333   : > { %v1864_v46 = vpop.eup %1410  ;;  %v817_v35 = vmul.f32 1.442695, %v788_v45 }
 0x334   : > { %v768_v47 = vpop.xlane.xlu1 %767  ;;  %839 = vadd.xlane.f32.xlu1 %v1864_v46 }
 0x335   : > { %1416 = vpow2.f32 %v817_v35 }
 0x337   : > { %v1867_v49 = vpop.eup %1412 }
 0x338   : > { %845 = vadd.xlane.f32.xlu0 %v1867_v49  ;;  %v774_v38 = vpop.xlane.xlu1 %773 }
 0x339   : > { %v790_v51 = vsub.f32 %v1818_v48, %v774_v38  ;;  %v787_v48 = vsub.f32 %v1809_v44, %v768_v47 }
 0x33b   : > { %v1871_v52 = vpop.eup %1414  ;;  %v821_v53 = vmul.f32 1.442695, %v790_v51  ;;  %v815_v57 = vmul.f32 1.442695, %v787_v48 }
 0x33c   : > { %843 = vadd.xlane.f32.xlu1 %v1871_v52  ;;  %v772_v60 = vpop.xlane.xlu1 %771 }
 0x33d   : > { %1418 = vpow2.f32 %v821_v53  ;;  %v789_v62 = vsub.f32 %v1821_v50, %v772_v60 }
 0x33e   : > { %1420 = vpow2.f32 %v815_v57 }
 0x33f   : > { %v1874_v42 = vpop.eup %1416  ;;  %v819_v63 = vmul.f32 1.442695, %v789_v62 }
 0x340   : > { %849 = vadd.xlane.f32.xlu0 %v1874_v42 }
 0x341   : > { %1422 = vpow2.f32 %v819_v63 }
 0x347   : > { %v1877_v54 = vpop.eup %1418 }
 0x348   : > { %853 = vadd.xlane.f32.xlu0 %v1877_v54  ;;  %v1883_v58 = vpop.eup %1420 }
 0x34b   : > { %v1888_v3 = vpop.eup %1422 }
 0x34d   : > { %334 = vperm.xlu1 %1391, %v324_v55  }
 0x35e   : > { %339 = vperm.xlu0 %1390, %v325_v56  }
 0x371   : > { %847 = vadd.xlane.f32.xlu1 %v1883_v58 }
 0x382   : > { %344 = vperm.xlu1 %1391, %v326_v59  }
 0x39d   : > { %v826_v2 = vpop.xlane.xlu1 %825 }
 0x39e   : > { %1424 = vrcp.f32 %v826_v2 }
 0x3a1   : > { %v824_v61 = vpop.xlane.xlu1 %823 }
 0x3a2   : > { %1426 = vrcp.f32 %v824_v61 }
 0x3a5   : > { %v830_v44 = vpop.xlane.xlu1 %829 }
 0x3a6   : > { %851 = vadd.xlane.f32.xlu1 %v1888_v3  ;;  %1428 = vrcp.f32 %v830_v44 }
 0x3a8   : > { %v1425_v4 = vpop.eup %1424 }
 0x3a9   : > { %v828_v5 = vpop.xlane.xlu1 %827  ;;  %v872_v14 = vmul.f32 %v1425_v4, %v1828_v1 }
 0x3aa   : > { %1430 = vrcp.f32 %v828_v5 }
 0x3ac   : > { %v1427_v7 = vpop.eup %1426 }
 0x3ad   : > { %v834_v10 = vpop.xlane.xlu1 %833  ;;  %v871_v50 = vmul.f32 %v1427_v7, %v1832_v0 }
 0x3ae   : > { %1432 = vrcp.f32 %v834_v10 }
 0x3af   : > { %v1304_v12 = vpack.c.bf16 %v872_v14, %v871_v50 }
 0x3b0   : > { %v1429_v18 = vpop.eup %1428 }
 0x3b1   : > { %1305 = vmatprep.subr.bf16.mxu0 %v1304_v12  ;;  %v832_v17 = vpop.xlane.xlu1 %831  ;;  %v874_v26 = vmul.f32 %v1429_v18, %v1836_v6 }
 0x3b2   : > { %1434 = vrcp.f32 %v832_v17  ;;  %1307 = vmatpush3.bf16.xpose.msra.mxu0 %v1304_v12 }
 0x3b4   : > { %v1431_v16 = vpop.eup %1430 }
 0x3b5   : > { %v838_v23 = vpop.xlane.xlu1 %837  ;;  %v873_v19 = vmul.f32 %v1431_v16, %v1840_v15 }
 0x3b6   : > { %1436 = vrcp.f32 %v838_v23 }
 0x3b7   : > { %349 = vperm.xlu1 %1391, %v327_v21   ;;  %v1308_v30 = vpack.c.bf16 %v874_v26, %v873_v19 }
 0x3b8   : > { %v1433_v1 = vpop.eup %1432 }
 0x3b9   : > { %1309 = vmatprep.subr.bf16.mxu0 %v1308_v30  ;;  %v836_v0 = vpop.xlane.xlu1 %835  ;;  %v876_v25 = vmul.f32 %v1433_v1, %v1844_v20 }
 0x3ba   : > { %1438 = vrcp.f32 %v836_v0  ;;  %1311 = vmatpush3.bf16.xpose.msra.mxu0 %v1308_v30 }
 0x3bc   : > { %v1435_v22 = vpop.eup %1434 }
 0x3bd   : > { %v842_v34 = vpop.xlane.xlu1 %841  ;;  %v875_v36 = vmul.f32 %v1435_v22, %v1848_v24 }
 0x3be   : > { %1440 = vrcp.f32 %v842_v34 }
 0x3bf   : > { %v1312_v39 = vpack.c.bf16 %v876_v25, %v875_v36 }
 0x3c0   : > { %v1437_v40 = vpop.eup %1436 }
 0x3c1   : > { %1313 = vmatprep.subr.bf16.mxu0 %v1312_v39  ;;  %v840_v15 = vpop.xlane.xlu1 %839  ;;  %v878_v45 = vmul.f32 %v1437_v40, %v1852_v33 }
 0x3c2   : > { %1442 = vrcp.f32 %v840_v15  ;;  %1315 = vmatpush3.bf16.xpose.msra.mxu0 %v1312_v39 }
 0x3c4   : > { %v1439_v6 = vpop.eup %1438 }
 0x3c5   : > { %v846_v32 = vpop.xlane.xlu0 %845  ;;  %v877_v43 = vmul.f32 %v1439_v6, %v1856_v37 }
 0x3c6   : > { %1444 = vrcp.f32 %v846_v32 }
 0x3c7   : > { %v1316_v35 = vpack.c.bf16 %v878_v45, %v877_v43 }
 0x3c8   : > { %v1441_v24 = vpop.eup %1440 }
 0x3c9   : > { %1317 = vmatprep.subr.bf16.mxu0 %v1316_v35  ;;  %v844_v47 = vpop.xlane.xlu1 %843  ;;  %v880_v53 = vmul.f32 %v1441_v24, %v1860_v41 }
 0x3ca   : > { %1446 = vrcp.f32 %v844_v47  ;;  %1319 = vmatpush3.bf16.xpose.msra.mxu0 %v1316_v35 }
 0x3cc   : > { %v1443_v20 = vpop.eup %1442 }
 0x3cd   : > { %v335_v38 = vpop.permute.xlu1 %334  ;;  %v879_v51 = vmul.f32 %v1443_v20, %v1864_v46  ;;  %v850_v60 = vpop.xlane.xlu0 %849 }
 0x3ce   : > { %v464_v55 = vadd.f32 %v1706_v28, %v335_v38  ;;  %1448 = vrcp.f32 %v850_v60 }
 0x3cf   : > { %v1320_v56 = vpack.c.bf16 %v880_v53, %v879_v51 }
 0x3d0   : > { %1282 = vmatprep.mubr.f32.mxu0 %v464_v55  ;;  %v1445_v37 = vpop.eup %1444 }
 0x3d1   : > { %1321 = vmatprep.subr.bf16.mxu0 %v1320_v56  ;;  %v882_v57 = vmul.f32 %v1445_v37, %v1867_v49 }
 0x3d2   : > { %1323 = vmatpush3.bf16.xpose.msra.mxu0 %v1320_v56 }
 0x3d4   : > { %v1447_v33 = vpop.eup %1446 }
 0x3d5   : > { %v881_v48 = vmul.f32 %v1447_v33, %v1871_v52  ;;  %v854_v61 = vpop.xlane.xlu0 %853 }
 0x3d7   : > { %v1324_v59 = vpack.c.bf16 %v882_v57, %v881_v48 }
 0x3d8   : > { %v1449_v41 = vpop.eup %1448 }
 0x3d9   : > { %1325 = vmatprep.subr.bf16.mxu0 %v1324_v59  ;;  %v884_v63 = vmul.f32 %v1449_v41, %v1874_v42 }
 0x3da   : > { %1327 = vmatpush3.bf16.xpose.msra.mxu0 %v1324_v59 }
 0x3dd   : > { %v340_v42 = vpop.permute.xlu0 %339 }
 0x3fe   : > { %v848_v46 = vpop.xlane.xlu1 %847 }
 0x3ff   : > { %1450 = vrcp.f32 %v848_v46 }
 0x400   : > { %1452 = vrcp.f32 %v854_v61 }
 0x402   : > { %v345_v52 = vpop.permute.xlu1 %344 }
 0x403   : > { %v474_v50 = vadd.f32 %v1710_v31, %v345_v52 }
 0x409   : > { %v1451_v62 = vpop.eup %1450 }
 0x40a   : > { %v883_v28 = vmul.f32 %v1451_v62, %v1883_v58  ;;  %v1453_v44 = vpop.eup %1452  ;;  %v469_v58 = vadd.f32 %v1704_v27, %v340_v42 }
 0x40b   : > { %v886_v7 = vmul.f32 %v1453_v44, %v1877_v54 }
 0x40c   : > { %v1328_v2 = vpack.c.bf16 %v884_v63, %v883_v28 }
 0x40e   : > { %1329 = vmatprep.subr.bf16.mxu0 %v1328_v2 }
 0x40f   : > { %1331 = vmatpush3.bf16.xpose.msra.mxu0 %v1328_v2 }
 0x433   : > { %v852_v49 = vpop.xlane.xlu1 %851 }
 0x434   : > { %1454 = vrcp.f32 %v852_v49 }
 0x437   : > { %v350_v14 = vpop.permute.xlu1 %349 }
 0x438   : > { %v479_v12 = vadd.f32 %v1708_v29, %v350_v14 }
 0x43e   : > { %v1455_v5 = vpop.eup %1454 }
 0x43f   : > { %v885_v4 = vmul.f32 %v1455_v5, %v1888_v3  ;;  %v974_v3 = vstv %s973_s9 }
 0x441   : > { %v1332_v10 = vpack.c.bf16 %v886_v7, %v885_v4 }
 0x443   : > { %1333 = vmatprep.subr.bf16.mxu0 %v1332_v10 }
 0x444   : > { %1335 = vmatpush3.bf16.xpose.msra.mxu0 %v1332_v10 }
 0x44b   : > { %1283 = vmatmul.mubr.f32.vlgmr.msra.gmra.mrb[0].mxu0 %v469_v58 }
 0x44c   : > { %1285 = vmatprep.mubr.f32.mxu0 %v474_v50 }
 0x44f   : > { %1286 = vmatmul.mubr.f32.gmra.mrb[2].mxu0 %v479_v12 }
 0x51e   : > { %v1284_v54 = vpop.f32.mrb[0].mxu0 }
 0x51f   : > { %v976_v17 = vmul.f32 %v1284_v54, %v974_v3  ;;  %v953_v18 = vpop.f32.mrb[1].mxu0 }
 0x520   : > { %v975_v16 = vmul.f32 %v974_v3, %v953_v18 }
 0x521   : > { %v980_v27 = vadd.f32 %v976_v17, %v1669_v9 }
 0x522   : > { %v979_v31 = vadd.f32 %v975_v16, %v1667_v8  ;;  %v1287_v21 = vpop.f32.mrb[2].mxu0 }
 0x523   : > { %984 = vst [vmem:[%s288_s12 + $0x8] sm:$0xff] %v980_v27  ;;  %v978_v29 = vmul.f32 %v1287_v21, %v974_v3  ;;  %v963_v23 = vpop.f32.mrb[3].mxu0 }
 0x524   : > { %983 = vst [vmem:[%s288_s12] sm:$0xff] %v979_v31  ;;  %v977_v19 = vmul.f32 %v974_v3, %v963_v23 }
 0x525   : > { %v982_v26 = vadd.f32 %v978_v29, %v1679_v13 }
 0x526   : > { %v981_v8 = vadd.f32 %v977_v19, %v1671_v11 }
 0x527   : > { %986 = vst [vmem:[%s288_s12 + $0x18] sm:$0xff] %v982_v26 }
 0x528   : > { %985 = vst [vmem:[%s288_s12 + $0x10] sm:$0xff] %v981_v8 }
 0x529   : > { %1484 = shalt.err (!%p1481_p2)
}
 0x52a   : > { %s1485_s29 = scalar_lea.hbm %s1923_s15, 512  ;;  %s1489_s10 = scalar_lea.hbm %s1973_s6, 1024 }
 0x52b   : > { %p1486_p3 = scmp.ne.s32.totalorder %s1923_s15, %s1485_s29  ;;  %p1490_p8 = scmp.lt.u32.totalorder %s1923_s15, %s1973_s6 }
 0x52c   : > { %p1491_p11 = scmp.lt.u32.totalorder %s1489_s10, %s1485_s29  ;;  %p1493_p10 = scmp.lt.u32.totalorder %s1485_s29, %s1923_s15 }
 0x52d   : > { %p1487_p4 = pnand %p1486_p3, %p1617_p5 }
 0x52e   : > { %p1492_p9 = por %p1491_p11, %p1490_p8 }
 0x52f   : > { %p1488_p7 = pneg %p1487_p4 }
 0x530   : > { %p1494_p12 = por %p1493_p10, %p1492_p9 }
 0x532   : > { %p1495_p13 = pnand %p1494_p12, %p1488_p7 }
 0x534   : > { %1498 = shalt.err (!%p1495_p13)
}
 0x535   : > { %s1542_s14 = smov 128   ;;  %s1543_s17 = smov 8  }
 0x536   : > { %1340 = dma.vmem_to_hbm [thread:$0]  (%p1617_p5), %s1917_s13, 512, %s1923_s15, %s1926_s25, %s1542_s14, %s1542_s14, %s1543_s17  }
 0x537 PF: > { %p1352_p0 = scmp.ge.s32.totalorder %s1537_s24, 2  ;;  %s1016_s18 = sand.u32 1, %s1525_s21  }
 0x538   : > { %s1017_s16 = scalar_lea.sflag [#allocation3], %s1016_s18 }
 0x539   : > { %p1347_p1 = pnand %p1352_p0, %p1621_p6 }
 0x53b   : > { %1520 = dma.done.wait (!%p1347_p1), %s1017_s16, 512  }
 0x53c   : > { %1522 = vsyncadd (!%p1347_p1), %s1017_s16, 4294966784  ;;  %p17_p2 = scmp.ge.s32.totalorder %s1604_s27, 4   ;;  %s1977_s21 = smov %s1529_s22 }
 0x53d   : > { %s1978_s22 = smov %s1533_s23  ;;  %s1979_s23 = smov %s1615_s30 }
 0x53e   : > { %s1980_s24 = smov %s1604_s27  ;;  %19 = sbr.rel (!%p17_p2) target bundleno = 4 (0x4), region = 90 }
 0x545   :  { %1022 = vsyncpa [#allocation3], 1 }
 0x546   :  { %1024 = vsyncpa [#allocation3 + $0x1], 1 }
 0x547   :  { %1025 = vsyncpa [#allocation4], 1 }
 0x548   :  { %1027 = vsyncpa [#allocation4 + $0x1], 1 }

</bundles_post_ra>
